<compile_context>
chip_gen: v7x
topology: tpu7x:2x2x1
jax: 0.10.0
libtpu: 0.0.40
codegen_flags: <defaults>
</compile_context>

<pallas_src>
import functools

import jax
import jax.numpy as jnp
from jax.experimental import pallas as pl
from jax.experimental.pallas import tpu as pltpu


def multiview_mlp_kernel(x_ref, we_ref, be_ref, w1_ref, b1_ref, w2_ref, b2_ref,
                         out_ref, *, num_views, feat_dim):
    """One batch tile, whole network.

    x_ref : (TB, V*F)       f32   raw per-view features, view-contiguous on lanes
    we_ref: (V, F, D)       bf16  per-view encoder weights (VMEM resident)
    be_ref: (1, V*D)        f32   per-view encoder biases, view-major
    w1_ref: (V*D, HID)      bf16  fuse layer 1, rows pre-gathered to view-major
    b1_ref: (1, HID)        f32
    w2_ref: (HID, OUT_PAD)  bf16  fuse layer 2, zero-padded to 128 lanes
    b2_ref: (1, OUT_PAD)    f32
    out_ref:(TB, OUT_PAD)   f32 (or bf16)
    """
    # Per-view encoder: Flatten -> Linear -> ReLU.  The bf16 cast happens HERE,
    # on the VMEM tile, so x streams from HBM exactly once in native f32.
    views = []
    for v in range(num_views):                       # V is small & static -> unrolled
        xv = x_ref[:, pl.ds(v * feat_dim, feat_dim)].astype(jnp.bfloat16)
        views.append(jnp.dot(xv, we_ref[v], preferred_element_type=jnp.float32))

    # "stack(-1).flatten(-2)" is fused away: one lane-contiguous hidden slab in
    # view-major order; W1 rows were pre-gathered to the same order.
    h = jnp.concatenate(views, axis=-1)              # (TB, V*D) f32
    h = jnp.maximum(h + be_ref[...], 0.0)            # encoder bias + ReLU, once

    h1 = jnp.dot(h.astype(jnp.bfloat16), w1_ref[...],
                 preferred_element_type=jnp.float32)  # single K = V*D matmul
    h1 = jnp.maximum(h1 + b1_ref[...], 0.0)           # fuse hidden ReLU (f32)

    out = jnp.dot(h1.astype(jnp.bfloat16), w2_ref[...],
                  preferred_element_type=jnp.float32) + b2_ref[...]
    out_ref[...] = out.astype(out_ref.dtype)


def prepare_params(params):
    """One-time parameter prep (dtype casts, W1 row gather, output padding)."""
    We, be, W1, b1, W2, b2 = params
    V, F, D = We.shape
    HID = W1.shape[1]
    OUT = W2.shape[1]

    # PyTorch stack(dim=-1).flatten(-2) => fuse-input index d*V + v.
    # Gather W1 rows once into view-major order (row v*D + d) so the kernel can
    # run one K = V*D matmul against a view-contiguous hidden slab.
    W1_vm = jnp.transpose(W1.reshape(D, V, HID), (1, 0, 2)).reshape(V * D, HID)

    # Pad the output dim to a multiple of 128 lanes (unmasked, dense stores).
    OUT_PAD = ((OUT + 127) // 128) * 128
    W2p = jnp.pad(W2, ((0, 0), (0, OUT_PAD - OUT)))
    b2p = jnp.pad(b2, (0, OUT_PAD - OUT))

    prepped = (
        We.astype(jnp.bfloat16),                      # (V, F, D)
        be.reshape(1, V * D).astype(jnp.float32),     # (1, V*D)   view-major
        W1_vm.astype(jnp.bfloat16),                   # (V*D, HID) view-major rows
        b1.reshape(1, HID).astype(jnp.float32),       # (1, HID)
        W2p.astype(jnp.bfloat16),                     # (HID, OUT_PAD)
        b2p.reshape(1, OUT_PAD).astype(jnp.float32),  # (1, OUT_PAD)
    )
    return prepped, OUT


def multiview_mlp(x, prepped, out_dim, *, batch_tile=512, out_dtype=jnp.float32):
    """x: (B, V, C, H, W) float32.  Returns (B, out_dim) in `out_dtype`."""
    We, be, W1v, b1, W2, b2 = prepped
    B = x.shape[0]
    V, F, _D = We.shape
    OUT_PAD = W2.shape[-1]

    # Contiguous reshape only (no transpose, no host-side cast): x stays f32 in
    # HBM; the bf16 cast is done on the VMEM tile inside the kernel.
    x2 = x.reshape(B, V * F)

    # Batch tiling.  The f32 x tile (TB * V*F * 4 B, double-buffered) dominates
    # VMEM; TB=512 gets ~85% of HBM roofline while staying well under v7x's
    # 64 MiB for typical V*F.  No materialized batch pad: cdiv grid + Pallas
    # masking of the ragged last tile.  B > batch_tile => grid >= 2 steps, so
    # both v7x TensorCores are fed ("parallel" batch axis).
    TB = B if B <= batch_tile else batch_tile
    grid = (pl.cdiv(B, TB),)

    out_bytes = jnp.dtype(out_dtype).itemsize
    weight_bytes = sum(int(a.size) * a.dtype.itemsize for a in prepped)
    footprint = (2 * TB * V * F * 4              # double-buffered x tile (f32)
                 + 2 * TB * OUT_PAD * out_bytes  # double-buffered out tile
                 + 2 * weight_bytes)             # resident weights (2x buffered)
    vmem_limit = int(min(64 * 1024 * 1024,
                         max(32 * 1024 * 1024, footprint + 8 * 1024 * 1024)))

    def resident(a):
        nz = (0,) * a.ndim
        return pl.BlockSpec(a.shape, lambda i, _z=nz: _z)
    # TODO(synk): if real weights grow to multi-MiB, add
    # pipeline_mode=pl.Buffered(1) on these constant-index specs (and switch the
    # unrolled view loop to a VMEM scratch + lax.fori_loop for large V).

    kernel = functools.partial(multiview_mlp_kernel, num_views=V, feat_dim=F)
    out = pl.pallas_call(
        kernel,
        out_shape=jax.ShapeDtypeStruct((B, OUT_PAD), out_dtype),
        grid=grid,
        in_specs=[
            pl.BlockSpec((TB, V * F), lambda i: (i, 0)),   # pipelined x tile
            resident(We),                                  # weights stay in VMEM
            resident(be),
            resident(W1v),
            resident(b1),
            resident(W2),
            resident(b2),
        ],
        out_specs=pl.BlockSpec((TB, OUT_PAD), lambda i: (i, 0)),
        compiler_params=pltpu.CompilerParams(
            dimension_semantics=("parallel",),
            vmem_limit_bytes=vmem_limit,
        ),
    )(x2, We, be, W1v, b1, W2, b2)
    return out[:, :out_dim]


if __name__ == "__main__":
    # Small, deterministic problem sizes consistent with the module.
    B, V, C, H, W = 2, 2, 4, 16, 16       # batch, views, channels, spatial
    F = C * H * W                         # flattened per-view feature dim (1024)
    D = 32                                # encoder output_dim
    IN = V * D                            # fuse MLP input_dim
    HID = IN * 4                          # hidden_dim = input_dim * 4
    OUT = 16                              # output_dim

    key = jax.random.PRNGKey(0)
    ks = jax.random.split(key, 7)
    x  = jax.random.normal(ks[0], (B, V, C, H, W), jnp.float32)
    We = jax.random.normal(ks[1], (V, F, D), jnp.float32) / jnp.sqrt(F)
    be = jax.random.normal(ks[2], (V, D),    jnp.float32) * 0.01
    W1 = jax.random.normal(ks[3], (IN, HID), jnp.float32) / jnp.sqrt(IN)
    b1 = jax.random.normal(ks[4], (HID,),    jnp.float32) * 0.01
    W2 = jax.random.normal(ks[5], (HID, OUT), jnp.float32) / jnp.sqrt(HID)
    b2 = jax.random.normal(ks[6], (OUT,),     jnp.float32) * 0.01

    prepped, out_dim = prepare_params((We, be, W1, b1, W2, b2))  # one-time prep
    out = jax.block_until_ready(multiview_mlp(x, prepped, out_dim))

    # Pure-JAX reference mirroring the PyTorch forward (interleaved
    # stack(dim=-1).flatten(-2) ordering) with the same bf16-operand /
    # f32-accumulation arithmetic as the kernel.
    xb = x.reshape(B, V, F).astype(jnp.bfloat16)
    feats = []
    for v in range(V):
        h = jnp.dot(xb[:, v], We[v].astype(jnp.bfloat16),
                    preferred_element_type=jnp.float32)
        feats.append(jnp.maximum(h + be[v], 0.0))
    ref = jnp.stack(feats, axis=-1).reshape(B, D * V)            # interleaved order
    ref = jnp.maximum(
        jnp.dot(ref.astype(jnp.bfloat16), W1.astype(jnp.bfloat16),
                preferred_element_type=jnp.float32) + b1, 0.0)
    ref = jnp.dot(ref.astype(jnp.bfloat16), W2.astype(jnp.bfloat16),
                  preferred_element_type=jnp.float32) + b2

    assert out.shape == (B, OUT), out.shape
    max_err = float(jnp.max(jnp.abs(out - ref)))
    assert jnp.allclose(out, ref, rtol=1e-2, atol=1e-2), max_err
    print("KERNEL_OK")
</pallas_src>

<mosaic_0001>
module attributes {stable_mosaic.version = 11 : i64} {
  func.func @multiview_mlp_kernel(%arg0: i32, %arg1: memref<2x2048xf32, #tpu.memory_space<vmem>>, %arg2: memref<2x1024x32xbf16, #tpu.memory_space<vmem>>, %arg3: memref<1x64xf32, #tpu.memory_space<vmem>>, %arg4: memref<64x256xbf16, #tpu.memory_space<vmem>>, %arg5: memref<1x256xf32, #tpu.memory_space<vmem>>, %arg6: memref<256x128xbf16, #tpu.memory_space<vmem>>, %arg7: memref<1x128xf32, #tpu.memory_space<vmem>>, %arg8: memref<2x128xf32, #tpu.memory_space<vmem>>) attributes {dimension_semantics = [#tpu.dimension_semantics<parallel>], iteration_bounds = array<i64: 1>, scalar_prefetch = 0 : i64, scratch_operands = 0 : i64, tpu.core_type = #tpu.core_type<tc>, window_params = [{transform_indices = @transform_0, window_bounds = array<i64: 2, 2048>}, {pipeline_mode = #tpu.pipeline_mode<synchronous>, transform_indices = @transform_1, window_bounds = array<i64: 2, 1024, 32>}, {pipeline_mode = #tpu.pipeline_mode<synchronous>, transform_indices = @transform_2, window_bounds = array<i64: 1, 64>}, {pipeline_mode = #tpu.pipeline_mode<synchronous>, transform_indices = @transform_3, window_bounds = array<i64: 64, 256>}, {pipeline_mode = #tpu.pipeline_mode<synchronous>, transform_indices = @transform_4, window_bounds = array<i64: 1, 256>}, {pipeline_mode = #tpu.pipeline_mode<synchronous>, transform_indices = @transform_5, window_bounds = array<i64: 256, 128>}, {pipeline_mode = #tpu.pipeline_mode<synchronous>, transform_indices = @transform_6, window_bounds = array<i64: 1, 128>}, {transform_indices = @transform_7, window_bounds = array<i64: 2, 128>}]} {
    %c0 = arith.constant 0 : index
    %c0_0 = arith.constant 0 : index
    %0 = vector.load %arg1[%c0, %c0_0] : memref<2x2048xf32, #tpu.memory_space<vmem>>, vector<2x1024xf32>
    %1 = arith.truncf %0 : vector<2x1024xf32> to vector<2x1024xbf16>
    %c0_1 = arith.constant 0 : index
    %c0_2 = arith.constant 0 : index
    %c0_3 = arith.constant 0 : index
    %2 = vector.load %arg2[%c0_1, %c0_2, %c0_3] : memref<2x1024x32xbf16, #tpu.memory_space<vmem>>, vector<1x1024x32xbf16>
    %3 = vector.shape_cast %2 : vector<1x1024x32xbf16> to vector<1024x32xbf16>
    %cst = arith.constant dense<0.000000e+00> : vector<2x32xf32>
    %4 = tpu.matmul %1, %3, %cst {dimension_numbers = #tpu.dot_dimension_numbers<[1], [0], [0], [1], [0, 0, 1, 1], [], []>} : vector<2x1024xbf16>, vector<1024x32xbf16>, vector<2x32xf32> -> vector<2x32xf32>
    %c0_4 = arith.constant 0 : index
    %c1024 = arith.constant 1024 : index
    %5 = vector.load %arg1[%c0_4, %c1024] : memref<2x2048xf32, #tpu.memory_space<vmem>>, vector<2x1024xf32>
    %6 = arith.truncf %5 : vector<2x1024xf32> to vector<2x1024xbf16>
    %c1 = arith.constant 1 : index
    %c0_5 = arith.constant 0 : index
    %c0_6 = arith.constant 0 : index
    %7 = vector.load %arg2[%c1, %c0_5, %c0_6] : memref<2x1024x32xbf16, #tpu.memory_space<vmem>>, vector<1x1024x32xbf16>
    %8 = vector.shape_cast %7 : vector<1x1024x32xbf16> to vector<1024x32xbf16>
    %cst_7 = arith.constant dense<0.000000e+00> : vector<2x32xf32>
    %9 = tpu.matmul %6, %8, %cst_7 {dimension_numbers = #tpu.dot_dimension_numbers<[1], [0], [0], [1], [0, 0, 1, 1], [], []>} : vector<2x1024xbf16>, vector<1024x32xbf16>, vector<2x32xf32> -> vector<2x32xf32>
    %10 = tpu.concatenate %4, %9 in 1 : vector<2x32xf32>, vector<2x32xf32> -> vector<2x64xf32>
    %c0_8 = arith.constant 0 : index
    %c0_9 = arith.constant 0 : index
    %11 = vector.load %arg3[%c0_8, %c0_9] : memref<1x64xf32, #tpu.memory_space<vmem>>, vector<1x64xf32>
    %12 = vector.broadcast %11 : vector<1x64xf32> to vector<2x64xf32>
    %13 = arith.addf %10, %12 : vector<2x64xf32>
    %cst_10 = arith.constant 0.000000e+00 : f32
    %14 = vector.broadcast %cst_10 : f32 to vector<2x64xf32>
    %15 = arith.maximumf %13, %14 : vector<2x64xf32>
    %16 = arith.truncf %15 : vector<2x64xf32> to vector<2x64xbf16>
    %c0_11 = arith.constant 0 : index
    %c0_12 = arith.constant 0 : index
    %17 = vector.load %arg4[%c0_11, %c0_12] : memref<64x256xbf16, #tpu.memory_space<vmem>>, vector<64x256xbf16>
    %cst_13 = arith.constant dense<0.000000e+00> : vector<2x256xf32>
    %18 = tpu.matmul %16, %17, %cst_13 {dimension_numbers = #tpu.dot_dimension_numbers<[1], [0], [0], [1], [0, 0, 1, 1], [], []>} : vector<2x64xbf16>, vector<64x256xbf16>, vector<2x256xf32> -> vector<2x256xf32>
    %c0_14 = arith.constant 0 : index
    %c0_15 = arith.constant 0 : index
    %19 = vector.load %arg5[%c0_14, %c0_15] : memref<1x256xf32, #tpu.memory_space<vmem>>, vector<1x256xf32>
    %20 = vector.broadcast %19 : vector<1x256xf32> to vector<2x256xf32>
    %21 = arith.addf %18, %20 : vector<2x256xf32>
    %cst_16 = arith.constant 0.000000e+00 : f32
    %22 = vector.broadcast %cst_16 : f32 to vector<2x256xf32>
    %23 = arith.maximumf %21, %22 : vector<2x256xf32>
    %24 = arith.truncf %23 : vector<2x256xf32> to vector<2x256xbf16>
    %c0_17 = arith.constant 0 : index
    %c0_18 = arith.constant 0 : index
    %25 = vector.load %arg6[%c0_17, %c0_18] : memref<256x128xbf16, #tpu.memory_space<vmem>>, vector<256x128xbf16>
    %cst_19 = arith.constant dense<0.000000e+00> : vector<2x128xf32>
    %26 = tpu.matmul %24, %25, %cst_19 {dimension_numbers = #tpu.dot_dimension_numbers<[1], [0], [0], [1], [0, 0, 1, 1], [], []>} : vector<2x256xbf16>, vector<256x128xbf16>, vector<2x128xf32> -> vector<2x128xf32>
    %c0_20 = arith.constant 0 : index
    %c0_21 = arith.constant 0 : index
    %27 = vector.load %arg7[%c0_20, %c0_21] : memref<1x128xf32, #tpu.memory_space<vmem>>, vector<1x128xf32>
    %28 = vector.broadcast %27 : vector<1x128xf32> to vector<2x128xf32>
    %29 = arith.addf %26, %28 : vector<2x128xf32>
    %c0_22 = arith.constant 0 : index
    %c0_23 = arith.constant 0 : index
    %30 = vector.load %arg8[%c0_22, %c0_23] : memref<2x128xf32, #tpu.memory_space<vmem>>, vector<2x128xf32>
    tpu.vector_store %arg8[%c0_22, %c0_23], %29 {strides = array<i32>} : memref<2x128xf32, #tpu.memory_space<vmem>>, vector<2x128xf32>,
    return
  }
  func.func @transform_0(%arg0: i32) -> (i32, i32) {
    %c0_i32 = arith.constant 0 : i32
    %c0_i32_0 = arith.constant 0 : i32
    return %arg0, %c0_i32 : i32, i32
  }
  func.func @transform_1(%arg0: i32) -> (i32, i32, i32) {
    %c0_i32 = arith.constant 0 : i32
    %c0_i32_0 = arith.constant 0 : i32
    %c0_i32_1 = arith.constant 0 : i32
    %c0_i32_2 = arith.constant 0 : i32
    return %c0_i32, %c0_i32_0, %c0_i32_1 : i32, i32, i32
  }
  func.func @transform_2(%arg0: i32) -> (i32, i32) {
    %c0_i32 = arith.constant 0 : i32
    %c0_i32_0 = arith.constant 0 : i32
    %c0_i32_1 = arith.constant 0 : i32
    return %c0_i32, %c0_i32_0 : i32, i32
  }
  func.func @transform_3(%arg0: i32) -> (i32, i32) {
    %c0_i32 = arith.constant 0 : i32
    %c0_i32_0 = arith.constant 0 : i32
    %c0_i32_1 = arith.constant 0 : i32
    return %c0_i32, %c0_i32_0 : i32, i32
  }
  func.func @transform_4(%arg0: i32) -> (i32, i32) {
    %c0_i32 = arith.constant 0 : i32
    %c0_i32_0 = arith.constant 0 : i32
    %c0_i32_1 = arith.constant 0 : i32
    return %c0_i32, %c0_i32_0 : i32, i32
  }
  func.func @transform_5(%arg0: i32) -> (i32, i32) {
    %c0_i32 = arith.constant 0 : i32
    %c0_i32_0 = arith.constant 0 : i32
    %c0_i32_1 = arith.constant 0 : i32
    return %c0_i32, %c0_i32_0 : i32, i32
  }
  func.func @transform_6(%arg0: i32) -> (i32, i32) {
    %c0_i32 = arith.constant 0 : i32
    %c0_i32_0 = arith.constant 0 : i32
    %c0_i32_1 = arith.constant 0 : i32
    return %c0_i32, %c0_i32_0 : i32, i32
  }
  func.func @transform_7(%arg0: i32) -> (i32, i32) {
    %c0_i32 = arith.constant 0 : i32
    %c0_i32_0 = arith.constant 0 : i32
    return %arg0, %c0_i32 : i32, i32
  }
}

</mosaic_0001>

<bundles_post_ra>
// kernel: tpu_custom_call.1
= control target key start
LH: loop header
LB: loop body
LE: loop exit
PB: predicated region body
PF: predicated region fallthrough
CT: control target
= control target key end

     0   :  { %v36_v28 = vlaneseq  ;;  %v2465_v36 = vmov 1983009808   ;;  %s3016_s0 = inlined_call_operand.vmem [shape: f32[2,2048], index: 0, kind: input, shape index: {}]   ;;  %s3017_s1 = inlined_call_operand.vmem [shape: bf16[2,1024,32], index: 1, kind: input, shape index: {}]   ;;  %s3018_s2 = inlined_call_operand.vmem [shape: f32[1,64], index: 2, kind: input, shape index: {}]   ;;  %s3019_s3 = inlined_call_operand.vmem [shape: bf16[64,256], index: 3, kind: input, shape index: {}]   ;;  %s3020_s4 = inlined_call_operand.vmem [shape: f32[1,256], index: 4, kind: input, shape index: {}]   ;;  %s3021_s5 = inlined_call_operand.vmem [shape: bf16[256,128], index: 5, kind: input, shape index: {}]   ;;  %s3022_s6 = inlined_call_operand.vmem [shape: f32[1,128], index: 6, kind: input, shape index: {}]   ;;  %s3023_s7 = inlined_call_operand.hbm [shape: f32[2,128], index: 7, kind: output, shape index: {}]  }
   0x1   :  { %v2281_v0 = vld [vmem:[%s3017_s1 + $0x40] sm:$0xff]   ;;  %v2285_v4 = vld [vmem:[%s3017_s1 + $0x48] sm:$0xff]   ;;  %v2289_v8 = vld [vmem:[%s3017_s1 + $0x50] sm:$0xff]   ;;  %v34_v37 = vunpack.c.l.s4 %v2465_v36 }
   0x2   :  { %v2282_v1 = vld [vmem:[%s3017_s1 + $0xc0] sm:$0xff]   ;;  %2079 = vmatprep.subr.bf16.mxu0 %v2281_v0  ;;  %v2286_v5 = vld [vmem:[%s3017_s1 + $0xc8] sm:$0xff]   ;;  %v2290_v9 = vld [vmem:[%s3017_s1 + $0xd0] sm:$0xff]   ;;  %v2605_v33 = vshrl.u32 %v36_v28, 7 }
   0x3   :  { %v2283_v2 = vld [vmem:[%s3017_s1] sm:$0xff]   ;;  %2101 = vmatprep.subr.bf16.mxu1 %v2282_v1  ;;  %v2287_v6 = vld [vmem:[%s3017_s1 + $0x8] sm:$0xff]   ;;  %v2291_v10 = vld [vmem:[%s3017_s1 + $0x10] sm:$0xff]   ;;  %v35_v39 = vunpack.c.0.s8 %v34_v37 }
   0x4   :  { %v2284_v3 = vld [vmem:[%s3017_s1 + $0x80] sm:$0xff]   ;;  %2080 = vmatpush3.bf16.msra.mxu0 %v2283_v2  ;;  %v2288_v7 = vld [vmem:[%s3017_s1 + $0x88] sm:$0xff]   ;;  %v2292_v11 = vld [vmem:[%s3017_s1 + $0x90] sm:$0xff]  }
   0x5   :  { %2102 = vmatpush3.bf16.msra.mxu1 %v2284_v3  ;;  %2081 = vmatprep.subr.bf16.mxu0 %v2285_v4  ;;  %v2293_v12 = vld [vmem:[%s3017_s1 + $0x58] sm:$0xff]   ;;  %v2297_v16 = vld [vmem:[%s3017_s1 + $0x60] sm:$0xff]   ;;  %v2301_v20 = vld [vmem:[%s3017_s1 + $0x68] sm:$0xff]   ;;  %v2617_v41 = vsub.s32 %v35_v39, %v2605_v33 }
   0x6   :  { %2103 = vmatprep.subr.bf16.mxu1 %v2286_v5  ;;  %v2294_v13 = vld [vmem:[%s3017_s1 + $0xd8] sm:$0xff]   ;;  %v2298_v17 = vld [vmem:[%s3017_s1 + $0xe0] sm:$0xff]   ;;  %v2302_v21 = vld [vmem:[%s3017_s1 + $0xe8] sm:$0xff]  }
   0x7   :  { %v2295_v14 = vld [vmem:[%s3017_s1 + $0x18] sm:$0xff]   ;;  %v2299_v18 = vld [vmem:[%s3017_s1 + $0x20] sm:$0xff]   ;;  %v2303_v22 = vld [vmem:[%s3017_s1 + $0x28] sm:$0xff]  }
   0x8   :  { %2082 = vmatpush3.bf16.msra.mxu0 %v2287_v6  ;;  %v2296_v15 = vld [vmem:[%s3017_s1 + $0x98] sm:$0xff]   ;;  %v2300_v19 = vld [vmem:[%s3017_s1 + $0xa0] sm:$0xff]   ;;  %v2304_v23 = vld [vmem:[%s3017_s1 + $0xa8] sm:$0xff]  }
   0x9   :  { %2104 = vmatpush3.bf16.msra.mxu1 %v2288_v7  ;;  %2083 = vmatprep.subr.bf16.mxu0 %v2289_v8  ;;  %v2305_v24 = vld [vmem:[%s3017_s1 + $0x70] sm:$0xff]   ;;  %v2309_v29 = vld [vmem:[%s3017_s1 + $0x78] sm:$0xff]   ;;  %v28_v34 = vld [vmem:[%s3016_s0] sm:$0xff] }
   0xa   :  { %2105 = vmatprep.subr.bf16.mxu1 %v2290_v9  ;;  %v2306_v25 = vld [vmem:[%s3017_s1 + $0xf0] sm:$0xff]   ;;  %v2310_v30 = vld [vmem:[%s3017_s1 + $0xf8] sm:$0xff]   ;;  %v2314_v35 = vld [vmem:[%s3017_s1 + $0x140] sm:$0xff]   ;;  %v32_v40 = vcombine.high %v28_v34, %v28_v34  ;;  %v39_v42 = vrot.slane %v28_v34, %v2617_v41 }
   0xb   :  { %v2307_v26 = vld [vmem:[%s3017_s1 + $0x30] sm:$0xff]   ;;  %v2311_v31 = vld [vmem:[%s3017_s1 + $0x38] sm:$0xff]   ;;  %v2315_v38 = vld [vmem:[%s3017_s1 + $0x1c0] sm:$0xff]  }
   0xc   :  { %2084 = vmatpush3.bf16.msra.mxu0 %v2291_v10  ;;  %v2308_v27 = vld [vmem:[%s3017_s1 + $0xb0] sm:$0xff]   ;;  %v2312_v32 = vld [vmem:[%s3017_s1 + $0xb8] sm:$0xff]   ;;  %v46_v43 = vrot.slane %v32_v40, %v2617_v41  ;;  %v47_v44 = vcombine.high %v39_v42, %v39_v42  ;;  %v2316_v46 = vld [vmem:[%s3017_s1 + $0x100] sm:$0xff]   ;;  %v74_v47 = vpack.c.bf16 %v39_v42, %v39_v42 }
   0xd   :  { %2106 = vmatpush3.bf16.msra.mxu1 %v2292_v11  ;;  %2085 = vmatprep.subr.bf16.mxu0 %v2293_v12  ;;  %v2317_v49 = vld [vmem:[%s3017_s1 + $0x180] sm:$0xff]   ;;  %v2318_v52 = vld [vmem:[%s3017_s1 + $0x148] sm:$0xff]   ;;  %v2322_v56 = vld [vmem:[%s3017_s1 + $0x150] sm:$0xff]  }
   0xe   :  { %2107 = vmatprep.subr.bf16.mxu1 %v2294_v13  ;;  %v48_v45 = vcombine.high %v46_v43, %v46_v43  ;;  %v76_v48 = vpack.c.bf16 %v46_v43, %v46_v43  ;;  %v75_v50 = vpack.c.bf16 %v47_v44, %v47_v44  ;;  %v2319_v53 = vld [vmem:[%s3017_s1 + $0x1c8] sm:$0xff]   ;;  %v2323_v57 = vld [vmem:[%s3017_s1 + $0x1d0] sm:$0xff]   ;;  %v2326_v60 = vld [vmem:[%s3017_s1 + $0x158] sm:$0xff]  }
   0xf   :  { %v2320_v54 = vld [vmem:[%s3017_s1 + $0x108] sm:$0xff]   ;;  %v2324_v58 = vld [vmem:[%s3017_s1 + $0x110] sm:$0xff]   ;;  %v2327_v61 = vld [vmem:[%s3017_s1 + $0x1d8] sm:$0xff]  }
  0x10   :  { %2086 = vmatpush3.bf16.msra.mxu0 %v2295_v14  ;;  %v77_v51 = vpack.c.bf16 %v48_v45, %v48_v45  ;;  %626 = vmatprep.mubr.bf16.mxu0 %v75_v50  ;;  %v2321_v55 = vld [vmem:[%s3017_s1 + $0x188] sm:$0xff]   ;;  %v2325_v59 = vld [vmem:[%s3017_s1 + $0x190] sm:$0xff]   ;;  %v2328_v62 = vld [vmem:[%s3017_s1 + $0x118] sm:$0xff]  }
  0x11   :  { %2108 = vmatpush3.bf16.msra.mxu1 %v2296_v15  ;;  %2087 = vmatprep.subr.bf16.mxu0 %v2297_v16  ;;  %v2329_v63 = vld [vmem:[%s3017_s1 + $0x198] sm:$0xff]   ;;  %v2330_v0 = vld [vmem:[%s3017_s1 + $0x160] sm:$0xff]   ;;  %v2334_v4 = vld [vmem:[%s3017_s1 + $0x168] sm:$0xff]  }
  0x12   :  { %2109 = vmatprep.subr.bf16.mxu1 %v2298_v17  ;;  %666 = vmatprep.mubr.bf16.mxu1 %v77_v51  ;;  %v2331_v1 = vld [vmem:[%s3017_s1 + $0x1e0] sm:$0xff]   ;;  %v2335_v5 = vld [vmem:[%s3017_s1 + $0x1e8] sm:$0xff]   ;;  %v2338_v8 = vld [vmem:[%s3017_s1 + $0x170] sm:$0xff]  }
  0x13   :  { %v2332_v2 = vld [vmem:[%s3017_s1 + $0x120] sm:$0xff]   ;;  %v2336_v6 = vld [vmem:[%s3017_s1 + $0x128] sm:$0xff]   ;;  %v2339_v9 = vld [vmem:[%s3017_s1 + $0x1f0] sm:$0xff]  }
  0x14   :  { %2088 = vmatpush3.bf16.msra.mxu0 %v2299_v18  ;;  %v2333_v3 = vld [vmem:[%s3017_s1 + $0x1a0] sm:$0xff]   ;;  %v2337_v7 = vld [vmem:[%s3017_s1 + $0x1a8] sm:$0xff]   ;;  %v2340_v11 = vld [vmem:[%s3017_s1 + $0x130] sm:$0xff]  }
  0x15   :  { %2110 = vmatpush3.bf16.msra.mxu1 %v2300_v19  ;;  %2089 = vmatprep.subr.bf16.mxu0 %v2301_v20  ;;  %v29_v10 = vld [vmem:[%s3016_s0 + $0x8] sm:$0xff]  ;;  %v2341_v14 = vld [vmem:[%s3017_s1 + $0x1b0] sm:$0xff]   ;;  %v2342_v15 = vld [vmem:[%s3017_s1 + $0x178] sm:$0xff]  }
  0x16   :  { %2111 = vmatprep.subr.bf16.mxu1 %v2302_v21  ;;  %v56_v12 = vrot.slane %v29_v10, %v2617_v41  ;;  %v49_v13 = vcombine.high %v29_v10, %v29_v10  ;;  %v2343_v18 = vld [vmem:[%s3017_s1 + $0x1f8] sm:$0xff]   ;;  %v2354_v34 = vld [vmem:[%s3017_s1 + $0x288] sm:$0xff]   ;;  %v2356_v36 = vld [vmem:[%s3017_s1 + $0x2d0] sm:$0xff]  }
  0x17   :  { %v2344_v19 = vld [vmem:[%s3017_s1 + $0x138] sm:$0xff]   ;;  %v2357_v37 = vld [vmem:[%s3017_s1 + $0x210] sm:$0xff]   ;;  %v2363_v44 = vld [vmem:[%s3017_s1 + $0x260] sm:$0xff]  }
  0x18   :  { %2090 = vmatpush3.bf16.msra.mxu0 %v2303_v22  ;;  %v64_v16 = vcombine.high %v56_v12, %v56_v12  ;;  %v63_v17 = vrot.slane %v49_v13, %v2617_v41  ;;  %v2345_v22 = vld [vmem:[%s3017_s1 + $0x1b8] sm:$0xff]   ;;  %v2364_v45 = vld [vmem:[%s3017_s1 + $0x2e0] sm:$0xff]   ;;  %v2369_v50 = vld [vmem:[%s3017_s1 + $0x228] sm:$0xff]  }
  0x19   :  { %2112 = vmatpush3.bf16.msra.mxu1 %v2304_v23  ;;  %2091 = vmatprep.subr.bf16.mxu0 %v2305_v24  ;;  %v2347_v24 = vld [vmem:[%s3017_s1 + $0x240] sm:$0xff]   ;;  %v2359_v39 = vld [vmem:[%s3017_s1 + $0x258] sm:$0xff]   ;;  %v2370_v51 = vld [vmem:[%s3017_s1 + $0x2a8] sm:$0xff]  }
  0x1a   :  { %2113 = vmatprep.subr.bf16.mxu1 %v2306_v25  ;;  %v79_v20 = vpack.c.bf16 %v64_v16, %v64_v16  ;;  %v65_v21 = vcombine.high %v63_v17, %v63_v17  ;;  %v2348_v25 = vld [vmem:[%s3017_s1 + $0x2c0] sm:$0xff]   ;;  %v80_v28 = vpack.c.bf16 %v63_v17, %v63_v17  ;;  %v2360_v40 = vld [vmem:[%s3017_s1 + $0x2d8] sm:$0xff]   ;;  %v2384_v10 = vld [vmem:[%s3017_s1 + $0x348] sm:$0xff]  }
  0x1b   :  { %v2361_v42 = vld [vmem:[%s3017_s1 + $0x218] sm:$0xff]   ;;  %v2387_v13 = vld [vmem:[%s3017_s1 + $0x388] sm:$0xff]   ;;  %v2390_v16 = vld [vmem:[%s3017_s1 + $0x310] sm:$0xff]  }
  0x1c   :  { %2092 = vmatpush3.bf16.msra.mxu0 %v2307_v26  ;;  %v81_v23 = vpack.c.bf16 %v65_v21, %v65_v21  ;;  %v2349_v26 = vld [vmem:[%s3017_s1 + $0x200] sm:$0xff]   ;;  %v2362_v43 = vld [vmem:[%s3017_s1 + $0x298] sm:$0xff]   ;;  %v2391_v17 = vld [vmem:[%s3017_s1 + $0x390] sm:$0xff]  }
  0x1d   :  { %2114 = vmatpush3.bf16.msra.mxu1 %v2308_v27  ;;  %2093 = vmatprep.subr.bf16.mxu0 %v2309_v29  ;;  %v78_v27 = vpack.c.bf16 %v56_v12, %v56_v12  ;;  %v2350_v29 = vld [vmem:[%s3017_s1 + $0x280] sm:$0xff]   ;;  %v2386_v12 = vld [vmem:[%s3017_s1 + $0x308] sm:$0xff]   ;;  %v2395_v21 = vld [vmem:[%s3017_s1 + $0x398] sm:$0xff]  }
  0x1e   :  { %2115 = vmatprep.subr.bf16.mxu1 %v2310_v30  ;;  %v2351_v30 = vld [vmem:[%s3017_s1 + $0x248] sm:$0xff]  }
  0x20   :  { %2094 = vmatpush3.bf16.msra.mxu0 %v2311_v31  ;;  %v2352_v31 = vld [vmem:[%s3017_s1 + $0x2c8] sm:$0xff]  }
  0x21   :  { %2116 = vmatpush3.bf16.msra.mxu1 %v2312_v32  ;;  %2123 = vmatprep.subr.bf16.mxu0 %v2314_v35  ;;  %v2353_v32 = vld [vmem:[%s3017_s1 + $0x208] sm:$0xff]   ;;  %v2355_v35 = vld [vmem:[%s3017_s1 + $0x250] sm:$0xff]  }
  0x22   :  { %2145 = vmatprep.subr.bf16.mxu1 %v2315_v38  ;;  %v2358_v38 = vld [vmem:[%s3017_s1 + $0x290] sm:$0xff]  }
  0x23   :  { %627 = vmatmul.mubr.bf16.vlgmr.msra.gmra.mrb[0].mxu0 %v74_v47  ;;  %v2366_v47 = vld [vmem:[%s3017_s1 + $0x2a0] sm:$0xff]  }
  0x24   :  { %667 = vmatmul.mubr.bf16.vlgmr.msra.gmra.mrb[0].mxu1 %v76_v48  ;;  %2124 = vmatpush3.bf16.msra.mxu0 %v2316_v46  ;;  %v2365_v46 = vld [vmem:[%s3017_s1 + $0x220] sm:$0xff]   ;;  %v2367_v48 = vld [vmem:[%s3017_s1 + $0x268] sm:$0xff]  }
  0x25   :  { %2146 = vmatpush3.bf16.msra.mxu1 %v2317_v49  ;;  %2125 = vmatprep.subr.bf16.mxu0 %v2318_v52  ;;  %v2368_v49 = vld [vmem:[%s3017_s1 + $0x2e8] sm:$0xff]   ;;  %v2371_v52 = vld [vmem:[%s3017_s1 + $0x270] sm:$0xff]  }
  0x26   :  { %2147 = vmatprep.subr.bf16.mxu1 %v2319_v53  ;;  %706 = vmatprep.mubr.bf16.mxu0 %v79_v20  ;;  %v2372_v53 = vld [vmem:[%s3017_s1 + $0x2f0] sm:$0xff]   ;;  %v2394_v20 = vld [vmem:[%s3017_s1 + $0x318] sm:$0xff]  }
  0x27   :  { %746 = vmatprep.mubr.bf16.mxu1 %v81_v23  ;;  %v2397_v23 = vld [vmem:[%s3017_s1 + $0x3e0] sm:$0xff]  }
  0x28   :  { %2126 = vmatpush3.bf16.msra.mxu0 %v2320_v54  ;;  %v754_v54 = vld [vmem:[%s3016_s0 + $0x10] sm:$0xff] }
  0x29   :  { %2148 = vmatpush3.bf16.msra.mxu1 %v2321_v55  ;;  %2127 = vmatprep.subr.bf16.mxu0 %v2322_v56  ;;  %v2373_v55 = vld [vmem:[%s3017_s1 + $0x230] sm:$0xff]   ;;  %v765_v56 = vrot.slane %v754_v54, %v2617_v41 }
  0x2a   :  { %2149 = vmatprep.subr.bf16.mxu1 %v2323_v57  ;;  %v758_v57 = vcombine.high %v754_v54, %v754_v54 }
  0x2c   :  { %2128 = vmatpush3.bf16.msra.mxu0 %v2324_v58  ;;  %v2374_v58 = vld [vmem:[%s3017_s1 + $0x2b0] sm:$0xff]  }
  0x2d   :  { %2150 = vmatpush3.bf16.msra.mxu1 %v2325_v59  ;;  %2129 = vmatprep.subr.bf16.mxu0 %v2326_v60  ;;  %v2375_v59 = vld [vmem:[%s3017_s1 + $0x278] sm:$0xff]   ;;  %v773_v60 = vcombine.high %v765_v56, %v765_v56 }
  0x2e   :  { %2151 = vmatprep.subr.bf16.mxu1 %v2327_v61  ;;  %v772_v61 = vrot.slane %v758_v57, %v2617_v41 }
  0x30   :  { %2130 = vmatpush3.bf16.msra.mxu0 %v2328_v62  ;;  %v2376_v62 = vld [vmem:[%s3017_s1 + $0x2f8] sm:$0xff]  }
  0x31   :  { %2152 = vmatpush3.bf16.msra.mxu1 %v2329_v63  ;;  %2131 = vmatprep.subr.bf16.mxu0 %v2330_v0  ;;  %v2377_v63 = vld [vmem:[%s3017_s1 + $0x238] sm:$0xff]   ;;  %v801_v0 = vpack.c.bf16 %v773_v60, %v773_v60 }
  0x32   :  { %2153 = vmatprep.subr.bf16.mxu1 %v2331_v1  ;;  %v774_v1 = vcombine.high %v772_v61, %v772_v61 }
  0x34   :  { %2132 = vmatpush3.bf16.msra.mxu0 %v2332_v2  ;;  %v2378_v2 = vld [vmem:[%s3017_s1 + $0x2b8] sm:$0xff]  }
  0x35   :  { %2154 = vmatpush3.bf16.msra.mxu1 %v2333_v3  ;;  %2133 = vmatprep.subr.bf16.mxu0 %v2334_v4  ;;  %v803_v3 = vpack.c.bf16 %v774_v1, %v774_v1  ;;  %v2380_v4 = vld [vmem:[%s3017_s1 + $0x340] sm:$0xff]  }
  0x36   :  { %2155 = vmatprep.subr.bf16.mxu1 %v2335_v5  ;;  %v2381_v5 = vld [vmem:[%s3017_s1 + $0x3c0] sm:$0xff]  }
  0x38   :  { %2134 = vmatpush3.bf16.msra.mxu0 %v2336_v6  ;;  %v2382_v6 = vld [vmem:[%s3017_s1 + $0x300] sm:$0xff]  }
  0x39   :  { %2156 = vmatpush3.bf16.msra.mxu1 %v2337_v7  ;;  %2135 = vmatprep.subr.bf16.mxu0 %v2338_v8  ;;  %v800_v7 = vpack.c.bf16 %v765_v56, %v765_v56  ;;  %v802_v8 = vpack.c.bf16 %v772_v61, %v772_v61 }
  0x3a   :  { %2157 = vmatprep.subr.bf16.mxu1 %v2339_v9  ;;  %v2383_v9 = vld [vmem:[%s3017_s1 + $0x380] sm:$0xff]  }
  0x3c   :  { %2136 = vmatpush3.bf16.msra.mxu0 %v2340_v11  ;;  %v2385_v11 = vld [vmem:[%s3017_s1 + $0x3c8] sm:$0xff]  }
  0x3d   :  { %2158 = vmatpush3.bf16.msra.mxu1 %v2341_v14  ;;  %2137 = vmatprep.subr.bf16.mxu0 %v2342_v15  ;;  %v2388_v14 = vld [vmem:[%s3017_s1 + $0x350] sm:$0xff]  }
  0x3e   :  { %2159 = vmatprep.subr.bf16.mxu1 %v2343_v18  ;;  %v2389_v15 = vld [vmem:[%s3017_s1 + $0x3d0] sm:$0xff]   ;;  %v2392_v18 = vld [vmem:[%s3017_s1 + $0x358] sm:$0xff]  }
  0x40   :  { %2138 = vmatpush3.bf16.msra.mxu0 %v2344_v19  ;;  %v2393_v19 = vld [vmem:[%s3017_s1 + $0x3d8] sm:$0xff]  }
  0x41   :  { %2160 = vmatpush3.bf16.msra.mxu1 %v2345_v22  ;;  %2167 = vmatprep.subr.bf16.mxu0 %v2347_v24  ;;  %v2396_v22 = vld [vmem:[%s3017_s1 + $0x360] sm:$0xff]  }
  0x42   :  { %2189 = vmatprep.subr.bf16.mxu1 %v2348_v25  ;;  %v2398_v24 = vld [vmem:[%s3017_s1 + $0x320] sm:$0xff]  }
  0x43   :  { %707 = vmatmul.mubr.bf16.vlgmr.msra.gmra.mrb[4].mxu0 %v78_v27  ;;  %v2399_v25 = vld [vmem:[%s3017_s1 + $0x3a0] sm:$0xff]   ;;  %v2401_v27 = vld [vmem:[%s3017_s1 + $0x3e8] sm:$0xff]  }
  0x44   :  { %747 = vmatmul.mubr.bf16.vlgmr.msra.gmra.mrb[4].mxu1 %v80_v28  ;;  %2168 = vmatpush3.bf16.msra.mxu0 %v2349_v26  ;;  %v2400_v26 = vld [vmem:[%s3017_s1 + $0x368] sm:$0xff]  }
  0x45   :  { %2190 = vmatpush3.bf16.msra.mxu1 %v2350_v29  ;;  %2169 = vmatprep.subr.bf16.mxu0 %v2351_v30  ;;  %v2402_v28 = vld [vmem:[%s3017_s1 + $0x328] sm:$0xff]   ;;  %v2404_v30 = vld [vmem:[%s3017_s1 + $0x370] sm:$0xff]  }
  0x46   :  { %2191 = vmatprep.subr.bf16.mxu1 %v2352_v31  ;;  %1353 = vmatprep.mubr.bf16.mxu0 %v801_v0  ;;  %v2403_v29 = vld [vmem:[%s3017_s1 + $0x3a8] sm:$0xff]   ;;  %v2405_v31 = vld [vmem:[%s3017_s1 + $0x3f0] sm:$0xff]  }
  0x47   :  { %1393 = vmatprep.mubr.bf16.mxu1 %v803_v3 }
  0x48   :  { %2170 = vmatpush3.bf16.msra.mxu0 %v2353_v32  ;;  %v2406_v32 = vld [vmem:[%s3017_s1 + $0x330] sm:$0xff]  }
  0x49   :  { %2192 = vmatpush3.bf16.msra.mxu1 %v2354_v34  ;;  %2171 = vmatprep.subr.bf16.mxu0 %v2355_v35  ;;  %v2407_v34 = vld [vmem:[%s3017_s1 + $0x3b0] sm:$0xff]   ;;  %v755_v35 = vld [vmem:[%s3016_s0 + $0x18] sm:$0xff] }
  0x4a   :  { %2193 = vmatprep.subr.bf16.mxu1 %v2356_v36  ;;  %v2408_v36 = vld [vmem:[%s3017_s1 + $0x378] sm:$0xff]  }
  0x4c   :  { %2172 = vmatpush3.bf16.msra.mxu0 %v2357_v37  ;;  %v2409_v37 = vld [vmem:[%s3017_s1 + $0x3f8] sm:$0xff]  }
  0x4d   :  { %2194 = vmatpush3.bf16.msra.mxu1 %v2358_v38  ;;  %2173 = vmatprep.subr.bf16.mxu0 %v2359_v39  ;;  %v782_v38 = vrot.slane %v755_v35, %v2617_v41  ;;  %v775_v39 = vcombine.high %v755_v35, %v755_v35 }
  0x4e   :  { %2195 = vmatprep.subr.bf16.mxu1 %v2360_v40 }
  0x4f   :  { %v790_v40 = vcombine.high %v782_v38, %v782_v38 }
  0x50   :  { %2174 = vmatpush3.bf16.msra.mxu0 %v2361_v42  ;;  %v789_v42 = vrot.slane %v775_v39, %v2617_v41 }
  0x51   :  { %2196 = vmatpush3.bf16.msra.mxu1 %v2362_v43  ;;  %2175 = vmatprep.subr.bf16.mxu0 %v2363_v44  ;;  %v2410_v43 = vld [vmem:[%s3017_s1 + $0x338] sm:$0xff]  }
  0x52   :  { %2197 = vmatprep.subr.bf16.mxu1 %v2364_v45  ;;  %v2411_v44 = vld [vmem:[%s3017_s1 + $0x3b8] sm:$0xff]   ;;  %v805_v45 = vpack.c.bf16 %v790_v40, %v790_v40 }
  0x54   :  { %2176 = vmatpush3.bf16.msra.mxu0 %v2365_v46  ;;  %v791_v46 = vcombine.high %v789_v42, %v789_v42 }
  0x55   :  { %2198 = vmatpush3.bf16.msra.mxu1 %v2366_v47  ;;  %2177 = vmatprep.subr.bf16.mxu0 %v2367_v48  ;;  %v804_v48 = vpack.c.bf16 %v782_v38, %v782_v38 }
  0x56   :  { %2199 = vmatprep.subr.bf16.mxu1 %v2368_v49  ;;  %v807_v47 = vpack.c.bf16 %v791_v46, %v791_v46  ;;  %v806_v49 = vpack.c.bf16 %v789_v42, %v789_v42 }
  0x58   :  { %2178 = vmatpush3.bf16.msra.mxu0 %v2369_v50 }
  0x59   :  { %2200 = vmatpush3.bf16.msra.mxu1 %v2370_v51  ;;  %2179 = vmatprep.subr.bf16.mxu0 %v2371_v52 }
  0x5a   :  { %2201 = vmatprep.subr.bf16.mxu1 %v2372_v53 }
  0x5c   :  { %2180 = vmatpush3.bf16.msra.mxu0 %v2373_v55 }
  0x5d   :  { %2202 = vmatpush3.bf16.msra.mxu1 %v2374_v58  ;;  %2181 = vmatprep.subr.bf16.mxu0 %v2375_v59 }
  0x5e   :  { %2203 = vmatprep.subr.bf16.mxu1 %v2376_v62 }
  0x60   :  { %2182 = vmatpush3.bf16.msra.mxu0 %v2377_v63 }
  0x61   :  { %2204 = vmatpush3.bf16.msra.mxu1 %v2378_v2  ;;  %2211 = vmatprep.subr.bf16.mxu0 %v2380_v4 }
  0x62   :  { %2233 = vmatprep.subr.bf16.mxu1 %v2381_v5 }
  0x63   :  { %1354 = vmatmul.mubr.bf16.vlgmr.msra.gmra.mrb[8].mxu0 %v800_v7 }
  0x64   :  { %1394 = vmatmul.mubr.bf16.vlgmr.msra.gmra.mrb[8].mxu1 %v802_v8  ;;  %2212 = vmatpush3.bf16.msra.mxu0 %v2382_v6 }
  0x65   :  { %2234 = vmatpush3.bf16.msra.mxu1 %v2383_v9  ;;  %2213 = vmatprep.subr.bf16.mxu0 %v2384_v10 }
  0x66   :  { %2235 = vmatprep.subr.bf16.mxu1 %v2385_v11  ;;  %1433 = vmatprep.mubr.bf16.mxu0 %v805_v45 }
  0x67   :  { %1473 = vmatprep.mubr.bf16.mxu1 %v807_v47 }
  0x68   :  { %2214 = vmatpush3.bf16.msra.mxu0 %v2386_v12 }
  0x69   :  { %2236 = vmatpush3.bf16.msra.mxu1 %v2387_v13  ;;  %2215 = vmatprep.subr.bf16.mxu0 %v2388_v14 }
  0x6a   :  { %2237 = vmatprep.subr.bf16.mxu1 %v2389_v15 }
  0x6c   :  { %2216 = vmatpush3.bf16.msra.mxu0 %v2390_v16 }
  0x6d   :  { %2238 = vmatpush3.bf16.msra.mxu1 %v2391_v17  ;;  %2217 = vmatprep.subr.bf16.mxu0 %v2392_v18 }
  0x6e   :  { %2239 = vmatprep.subr.bf16.mxu1 %v2393_v19 }
  0x70   :  { %2218 = vmatpush3.bf16.msra.mxu0 %v2394_v20 }
  0x71   :  { %2240 = vmatpush3.bf16.msra.mxu1 %v2395_v21  ;;  %2219 = vmatprep.subr.bf16.mxu0 %v2396_v22 }
  0x72   :  { %2241 = vmatprep.subr.bf16.mxu1 %v2397_v23 }
  0x74   :  { %2220 = vmatpush3.bf16.msra.mxu0 %v2398_v24 }
  0x75   :  { %2242 = vmatpush3.bf16.msra.mxu1 %v2399_v25  ;;  %2221 = vmatprep.subr.bf16.mxu0 %v2400_v26 }
  0x76   :  { %2243 = vmatprep.subr.bf16.mxu1 %v2401_v27 }
  0x78   :  { %2222 = vmatpush3.bf16.msra.mxu0 %v2402_v28 }
  0x79   :  { %2244 = vmatpush3.bf16.msra.mxu1 %v2403_v29  ;;  %2223 = vmatprep.subr.bf16.mxu0 %v2404_v30 }
  0x7a   :  { %2245 = vmatprep.subr.bf16.mxu1 %v2405_v31 }
  0x7c   :  { %2224 = vmatpush3.bf16.msra.mxu0 %v2406_v32 }
  0x7d   :  { %2246 = vmatpush3.bf16.msra.mxu1 %v2407_v34  ;;  %2225 = vmatprep.subr.bf16.mxu0 %v2408_v36 }
  0x7e   :  { %2247 = vmatprep.subr.bf16.mxu1 %v2409_v37 }
  0x80   :  { %2226 = vmatpush3.bf16.msra.mxu0 %v2410_v43 }
  0x81   :  { %2248 = vmatpush3.bf16.msra.mxu1 %v2411_v44 }
  0x83   :  { %1434 = vmatmul.mubr.bf16.vlgmr.msra.gmra.mrb[12].mxu0 %v804_v48 }
  0x84   :  { %1474 = vmatmul.mubr.bf16.vlgmr.msra.gmra.mrb[12].mxu1 %v806_v49 }
  0x85   :  { %12 = vsyncpa [#allocation3], 0  ;;  %v2413_v41 = vld [vmem:[%s3019_s3] ss:$8 sps:$4 sm:$0xff]   ;;  %v2415_v50 = vld [vmem:[%s3019_s3 + $0x4] ss:$8 sps:$4 sm:$0xff]  }
  0x86   :  { %v2418_v51 = vld [vmem:[%s3019_s3 + $0x14] ss:$8 sps:$4 sm:$0xff]   ;;  %1561 = vmatprep.subr.bf16.mxu0 %v2415_v50  ;;  %v2416_v52 = vld [vmem:[%s3019_s3 + $0x10] ss:$8 sps:$4 sm:$0xff]   ;;  %v2421_v23 = vld [vmem:[%s3019_s3 + $0x24] ss:$8 sps:$4 sm:$0xff]  }
  0x87   :  { %1562 = vmatpush1.bf16.msra.mxu0 %v2413_v41  ;;  %v2419_v24 = vld [vmem:[%s3019_s3 + $0x20] ss:$8 sps:$4 sm:$0xff]   ;;  %v2424_v25 = vld [vmem:[%s3019_s3 + $0x34] ss:$8 sps:$4 sm:$0xff]   ;;  %v2422_v26 = vld [vmem:[%s3019_s3 + $0x30] ss:$8 sps:$4 sm:$0xff]  }
  0x88   :  { %1563 = vmatprep.subr.bf16.mxu0 %v2418_v51  ;;  %v2466_v31 = vmov 0   ;;  %v2425_v37 = vld [vmem:[%s3021_s5 + $0x40] sm:$0xff]   ;;  %v2427_v39 = vld [vmem:[%s3021_s5 + $0x48] sm:$0xff]   ;;  %v2429_v46 = vld [vmem:[%s3021_s5 + $0x50] sm:$0xff]   ;;  %s2467_s11 = smov 32   ;;  %vm1485_vm0 = vcmask 261120  }
  0x89   :  { %1593 = vmatprep.mubr.bf16.mxu0 %v2466_v31  ;;  %v2426_v38 = vld [vmem:[%s3021_s5] sm:$0xff]   ;;  %2255 = vmatprep.subr.bf16.mxu1 %v2425_v37  ;;  %v2428_v44 = vld [vmem:[%s3021_s5 + $0x8] sm:$0xff]   ;;  %v2430_v47 = vld [vmem:[%s3021_s5 + $0x10] sm:$0xff]   ;;  %vm1557_vm1 = vcmask 523264  }
  0x8a   :  { %2256 = vmatpush3.bf16.msra.mxu1 %v2426_v38  ;;  %v2431_v48 = vld [vmem:[%s3021_s5 + $0x58] sm:$0xff]   ;;  %v2433_v41 = vld [vmem:[%s3021_s5 + $0x60] sm:$0xff]   ;;  %v2435_v51 = vld [vmem:[%s3021_s5 + $0x68] sm:$0xff]  }
  0x8b   :  { %1564 = vmatpush1.bf16.msra.mxu0 %v2416_v52  ;;  %2257 = vmatprep.subr.bf16.mxu1 %v2427_v39  ;;  %v2432_v49 = vld [vmem:[%s3021_s5 + $0x18] sm:$0xff]   ;;  %v2434_v50 = vld [vmem:[%s3021_s5 + $0x20] sm:$0xff]   ;;  %v2436_v52 = vld [vmem:[%s3021_s5 + $0x28] sm:$0xff]  }
  0x8c   :  { %1565 = vmatprep.subr.bf16.mxu0 %v2421_v23 }
  0x8e   :  { %2258 = vmatpush3.bf16.msra.mxu1 %v2428_v44 }
  0x8f   :  { %1566 = vmatpush1.bf16.msra.mxu0 %v2419_v24  ;;  %2259 = vmatprep.subr.bf16.mxu1 %v2429_v46 }
  0x90   :  { %1567 = vmatprep.subr.bf16.mxu0 %v2424_v25 }
  0x92   :  { %2260 = vmatpush3.bf16.msra.mxu1 %v2430_v47 }
  0x93   :  { %1568 = vmatpush1.bf16.msra.mxu0 %v2422_v26  ;;  %2261 = vmatprep.subr.bf16.mxu1 %v2431_v48 }
  0x96   :  { %2262 = vmatpush3.bf16.msra.mxu1 %v2432_v49 }
  0x97   :  { %2263 = vmatprep.subr.bf16.mxu1 %v2433_v41 }
  0x9a   :  { %2264 = vmatpush3.bf16.msra.mxu1 %v2434_v50 }
  0x9b   :  { %2265 = vmatprep.subr.bf16.mxu1 %v2435_v51 }
  0x9e   :  { %2266 = vmatpush3.bf16.msra.mxu1 %v2436_v52 }
  0xf6   :  { %v2095_v53 = vpop.f32.mrb[0].mxu0 }
  0xf7   :  { %v2117_v54 = vpop.f32.mrb[0].mxu1  ;;  %v2096_v55 = vpop.f32.mrb[1].mxu0 }
  0xf8   :  { %v2118_v56 = vpop.f32.mrb[1].mxu1  ;;  %v2097_v57 = vadd.f32 %v2096_v55, %v2095_v53  ;;  %v2098_v59 = vpop.f32.mrb[2].mxu0  ;;  %v2052_v53 = vld [vmem:[%s3018_s2] ss:$0 sm:$0xff] }
  0xf9   :  { %v2119_v58 = vadd.f32 %v2118_v56, %v2117_v54  ;;  %v2120_v60 = vpop.f32.mrb[2].mxu1  ;;  %v2099_v61 = vpop.f32.mrb[3].mxu0  ;;  %v2437_v59 = vld [vmem:[%s3021_s5 + $0x70] sm:$0xff]  }
  0xfa   :  { %v2121_v62 = vpop.f32.mrb[3].mxu1  ;;  %v2438_v60 = vld [vmem:[%s3021_s5 + $0x30] sm:$0xff]   ;;  %2267 = vmatprep.subr.bf16.mxu1 %v2437_v59  ;;  %v2439_v61 = vld [vmem:[%s3021_s5 + $0x78] sm:$0xff]  }
  0xfb   :  { %v669_v63 = vadd.f32 %v2119_v58, %v2097_v57  ;;  %2268 = vmatpush3.bf16.msra.mxu1 %v2438_v60  ;;  %v2440_v62 = vld [vmem:[%s3021_s5 + $0x38] sm:$0xff]  }
  0xfc   :  { %2269 = vmatprep.subr.bf16.mxu1 %v2439_v61 }
  0xff   :  { %2270 = vmatpush3.bf16.msra.mxu1 %v2440_v62 }
 0x116   :  { %v2139_v0 = vpop.f32.mrb[4].mxu0 }
 0x117   :  { %v2161_v1 = vpop.f32.mrb[4].mxu1  ;;  %v2140_v2 = vpop.f32.mrb[5].mxu0 }
 0x118   :  { %v2162_v3 = vpop.f32.mrb[5].mxu1  ;;  %v2141_v4 = vadd.f32 %v2140_v2, %v2139_v0  ;;  %v2142_v6 = vpop.f32.mrb[6].mxu0  ;;  %v1505_v0 = vld [vmem:[%s3020_s4] sm:$0x3] }
 0x119   :  { %v2163_v5 = vadd.f32 %v2162_v3, %v2161_v1  ;;  %v2164_v7 = vpop.f32.mrb[6].mxu1  ;;  %v2143_v8 = vpop.f32.mrb[7].mxu0  ;;  %v1513_v1 = vsub.s32 1, %v2605_v33 }
 0x11a   :  { %v2165_v9 = vpop.f32.mrb[7].mxu1  ;;  %v709_v10 = vadd.f32 %v2141_v4, %v669_v63  ;;  %v1509_v63 = vsub.s32 0, %v2605_v33  ;;  %v2062_v33 = vld [vmem:[%s3022_s6] ss:$0 sm:$0xff] }
 0x11b   :  { %v1514_v3 = vrot.slane %v1505_v0, %v1513_v1 }
 0x11c   :  { %v2930_v11 = vadd.f32 %v2163_v5, %v709_v10  ;;  %v1510_v2 = vrot.slane %v1505_v0, %v1509_v63 }
 0x136   :  { %v2183_v12 = vpop.f32.mrb[8].mxu0 }
 0x137   :  { %v2205_v13 = vpop.f32.mrb[8].mxu1  ;;  %v2184_v14 = vpop.f32.mrb[9].mxu0 }
 0x138   :  { %v2206_v15 = vpop.f32.mrb[9].mxu1  ;;  %v2185_v16 = vadd.f32 %v2184_v14, %v2183_v12  ;;  %v2186_v18 = vpop.f32.mrb[10].mxu0 }
 0x139   :  { %v2207_v17 = vadd.f32 %v2206_v15, %v2205_v13  ;;  %v2208_v19 = vpop.f32.mrb[10].mxu1  ;;  %v2187_v20 = vpop.f32.mrb[11].mxu0 }
 0x13a   :  { %v2209_v21 = vpop.f32.mrb[11].mxu1 }
 0x13b   :  { %v1396_v22 = vadd.f32 %v2207_v17, %v2185_v16 }
 0x156   :  { %v2227_v27 = vpop.f32.mrb[12].mxu0 }
 0x157   :  { %v2249_v28 = vpop.f32.mrb[12].mxu1  ;;  %v2228_v29 = vpop.f32.mrb[13].mxu0 }
 0x158   :  { %v2250_v30 = vpop.f32.mrb[13].mxu1  ;;  %v2229_v32 = vadd.f32 %v2228_v29, %v2227_v27  ;;  %v2230_v35 = vpop.f32.mrb[14].mxu0 }
 0x159   :  { %v2251_v34 = vadd.f32 %v2250_v30, %v2249_v28  ;;  %v2252_v36 = vpop.f32.mrb[14].mxu1  ;;  %v2231_v40 = vpop.f32.mrb[15].mxu0 }
 0x15a   :  { %v2253_v42 = vpop.f32.mrb[15].mxu1  ;;  %v1436_v43 = vadd.f32 %v2229_v32, %v1396_v22 }
 0x15c   :  { %v1476_v45 = vadd.f32 %v2251_v34, %v1436_v43 }
 0x15e   :  { %1482 = vrot.lane.b32.xlu0 %v1476_v45, %s2467_s11  ;;  %s2468_s11 = smov [#allocation2]  }
 0x15f   :  { %s1788_s12 = sshll.u32 %s2468_s11, 4  ;;  %s1789_s12 = int_to_ptr.vmem [resolvable:$true] %s1788_s12 }
 0x160   :  { %s2441_s1 = scalar_lea.vmem %s1789_s12, 32  ;;  %p2446_p1 = scmp.lt.s32.totalorder %s1789_s12, %s1789_s12 }
 0x161   :  { %p2442_p0 = scmp.ne.s32.totalorder %s1789_s12, %s2441_s1  ;;  %p2447_p2 = scmp.lt.s32.totalorder %s2441_s1, %s2441_s1 }
 0x163   :  { %p2448_p3 = por %p2447_p2, %p2446_p1 }
 0x165   :  { %p2449_p4 = pnand %p2448_p3, %p2442_p0 }
 0x1d0   :  { %v1483_v54 = vpop.permute.xlu0 %1482 }
 0x1d1   :  { %v1486_v55 = vsel %vm1485_vm0, %v2930_v11, %v1483_v54 }
 0x1d2   :  { %v1494_v56 = vadd.f32 %v2052_v53, %v1486_v55 }
 0x1d4   :  { %v1495_v57 = vmax.f32 %v1494_v56, 0.0 }
 0x1d6   :  { %v1496_v58 = vpack.c.bf16 %v1495_v57, %v1495_v57 }
 0x1d8   :  { %2061 = vmatmul.mubr.msk.bf16.vlgmr.msra.gmra.mrb[16].mxu0 %vm1557_vm1, %v1496_v58 }
 0x2ab   :  { %v1595_v4 = vpop.f32.mrb[16].mxu0 }
 0x2ac   :  { %v1596_v5 = vadd.f32 %v1595_v4, %v1510_v2  ;;  %v1597_v6 = vpop.f32.mrb[17].mxu0 }
 0x2ad   :  { %v1598_v7 = vadd.f32 %v1597_v6, %v1514_v3  ;;  %v1599_v8 = vpop.f32.mrb[18].mxu0 }
 0x2ae   :  { %v1602_v9 = vmax.f32 %v1596_v5, 0.0  ;;  %v1600_v10 = vpop.f32.mrb[19].mxu0 }
 0x2af   :  { %v1603_v11 = vmax.f32 %v1598_v7, 0.0 }
 0x2b0   :  { %v1604_v13 = vpack.c.bf16 %v1602_v9, %v1602_v9 }
 0x2b1   :  { %v1605_v12 = vpack.c.bf16 %v1603_v11, %v1603_v11 }
 0x2b3   :  { %1773 = vmatprep.mubr.bf16.mxu1 %v1605_v12 }
 0x2b4   :  { %1774 = vmatmul.mubr.bf16.vlgmr.msra.gmra.mrb[16].mxu1 %v1604_v13 }
 0x387   :  { %v2271_v14 = vpop.f32.mrb[16].mxu1 }
 0x388   :  { %v2272_v15 = vpop.f32.mrb[17].mxu1 }
 0x389   :  { %v2273_v16 = vadd.f32 %v2272_v15, %v2271_v14  ;;  %v2274_v17 = vpop.f32.mrb[18].mxu1 }
 0x38a   :  { %v2275_v18 = vpop.f32.mrb[19].mxu1 }
 0x38b   :  { %v1776_v19 = vadd.f32 %v2273_v16, %v2062_v33 }
 0x38d   :  { %1781 = vst [vmem:[#allocation2] sm:$0x3] %v1776_v19 }
 0x38e   :  { %2452 = shalt.err (!%p2449_p4)
}
 0x38f   :  { %s2453_s15 = scalar_lea.hbm %s3023_s7, 32 }
 0x390   :  { %p2454_p5 = scmp.ne.s32.totalorder %s3023_s7, %s2453_s15  ;;  %p2457_p6 = scmp.lt.u32.totalorder %s2453_s15, %s3023_s7 }
 0x392   :  { %p2459_p7 = pnand %p2457_p6, %p2454_p5 }
 0x394   :  { %2462 = shalt.err (!%p2459_p7)
}
 0x395   :  { %1791 = dma.vmem_to_hbm [thread:$0]  %s1789_s12, 32, %s3023_s7, [#allocation3]  }
 0x396   :  { %2463 = dma.done.wait [#allocation3], 32  }
 0x397   :  { %2464 = vsyncadd [#allocation3], 4294967264 }
 0x398   :  { %1795 = vsyncpa [#allocation3], 1 }

</bundles_post_ra>
